<compile_context>
chip_gen: v6e
topology: v6e:2x2x1
jax: 0.10.0
libtpu: 0.0.40
codegen_flags: <defaults>
</compile_context>

<pallas_src>
import functools

import jax
import jax.numpy as jnp
from jax.experimental import pallas as pl
from jax.experimental.pallas import tpu as pltpu


_SMEM_OUT = pl.BlockSpec(memory_space=pltpu.MemorySpace.SMEM)

_VIDEO_TILE_BYTES = 1 << 20   # ~1 MiB per video input per pipeline buffer
_FUSED_MAX_ROWS = 512         # rows of (N, 64) exp coefficients per tile


# ----------------------------------------------------------------------------
# Tiling helper
# ----------------------------------------------------------------------------

def _pick_row_tiling(rows, max_rows):
    """Return (block_rows, n_tiles, ragged) for a 1-D row grid.

    Prefers a single full-array block, then an evenly dividing multiple-of-8
    block near max_rows, and only falls back to a ragged (in-kernel masked)
    last tile if no good divisor exists.
    """
    rows = int(rows)
    if rows <= max_rows:
        return rows, 1, False
    max_rows = max(8, (int(max_rows) // 8) * 8)
    floor = max(8, ((max_rows // 2) // 8) * 8)
    for br in range(max_rows, floor - 1, -8):
        if rows % br == 0:
            return br, rows // br, False
    return max_rows, -(-rows // max_rows), True


# ----------------------------------------------------------------------------
# Pallas kernels
# ----------------------------------------------------------------------------

def _fused_small_kernel(gt0, pr0, gt1, pr1, gt2, pr2, base_ref, mask_ref,
                        style_ref, pos_ref, neg_ref, out_ref, *,
                        block_rows, valid_rows, ragged):
    """Landmark-MSE split / exp-L1 / style-triplet partial sums.

    Uses GT_landmark - pred_landmark == (gt_exp - pred_exp) @ (10*expBase)^T
    (exact identity: the shared id part cancels), so one bf16 MXU matmul per
    prefix replaces the full id+exp reconstructions.

    Output (SMEM f32[5], accumulated across the row grid):
      [0] sum sq mouth-landmark diffs   (flat cols 144..203)
      [1] sum sq other-landmark diffs   (flat cols 0..143)
      [2] sum |pred_exp - gt_exp|
      [3] sum (style - pos_style)^2
      [4] sum (style - neg_style)^2
    """
    i = pl.program_id(0)
    base = base_ref[...]          # (64, 256) bf16, already scaled by 10
    mask = mask_ref[...]          # (1, 256)  f32, 1.0 on mouth columns

    mouth = jnp.float32(0.0)
    total = jnp.float32(0.0)
    l1 = jnp.float32(0.0)
    for gt_ref, pr_ref in ((gt0, pr0), (gt1, pr1), (gt2, pr2)):
        d = gt_ref[...] - pr_ref[...]                       # (rows, 64) f32
        if ragged:
            row = (jax.lax.broadcasted_iota(jnp.int32, d.shape, 0)
                   + i * block_rows)
            d = jnp.where(row < valid_rows, d, 0.0)
        face_d = jnp.dot(d.astype(jnp.bfloat16), base,
                         preferred_element_type=jnp.float32)  # (rows, 256)
        sq = face_d * face_d
        total = total + jnp.sum(sq)
        mouth = mouth + jnp.sum(sq * mask)
        l1 = l1 + jnp.sum(jnp.abs(d))

    @pl.when(i == 0)
    def _():
        out_ref[0] = jnp.float32(0.0)
        out_ref[1] = jnp.float32(0.0)
        out_ref[2] = jnp.float32(0.0)
        dp = style_ref[...] - pos_ref[...]
        dn = style_ref[...] - neg_ref[...]
        out_ref[3] = jnp.sum(dp * dp)
        out_ref[4] = jnp.sum(dn * dn)

    out_ref[0] = out_ref[0] + mouth
    out_ref[1] = out_ref[1] + (total - mouth)
    out_ref[2] = out_ref[2] + l1


def _video_l1_kernel(p0, g0, p1, g1, p2, g2, o_ref, *,
                     block_rows, valid_rows, ragged):
    """Per-tile sum of |p0-g0| + |p1-g1| + |p2-g2| (f32 accumulation).

    Each grid step writes its scalar partial broadcast into a private (8, 128)
    output block, so the grid axis can be "parallel" (v7x 2-TC split) and the
    final reduction over tiles happens outside the kernel.
    """
    f32 = jnp.float32
    acc = (jnp.abs(p0[...].astype(f32) - g0[...].astype(f32))
           + jnp.abs(p1[...].astype(f32) - g1[...].astype(f32))
           + jnp.abs(p2[...].astype(f32) - g2[...].astype(f32)))
    if ragged:
        row = (jax.lax.broadcasted_iota(jnp.int32, acc.shape, 0)
               + pl.program_id(0) * block_rows)
        acc = jnp.where(row < valid_rows, acc, 0.0)
    s = jnp.sum(acc)
    o_ref[...] = jnp.zeros((8, 128), jnp.float32) + s


# ----------------------------------------------------------------------------
# pallas_call wrappers
# ----------------------------------------------------------------------------

def fused_small_losses(gt_list, pr_list, exp_base10_t_bf16, mouth_mask,
                       style, pos_style, neg_style):
    rows = gt_list[0].shape[0]
    block_rows, n_tiles, ragged = _pick_row_tiling(rows, _FUSED_MAX_ROWS)

    kernel = functools.partial(_fused_small_kernel, block_rows=block_rows,
                               valid_rows=rows, ragged=ragged)
    exp_spec = pl.BlockSpec((block_rows, 64), lambda i: (i, 0))

    def full(a):
        return pl.BlockSpec(a.shape, lambda i: (0, 0))

    in_specs = ([exp_spec] * 6
                + [full(exp_base10_t_bf16), full(mouth_mask),
                   full(style), full(pos_style), full(neg_style)])

    return pl.pallas_call(
        kernel,
        out_shape=jax.ShapeDtypeStruct((5,), jnp.float32),
        grid=(n_tiles,),
        in_specs=in_specs,
        out_specs=_SMEM_OUT,
        compiler_params=pltpu.CompilerParams(
            dimension_semantics=("arbitrary",),   # carries the SMEM accumulator
            vmem_limit_bytes=16 * 1024 * 1024),
    )(gt_list[0], pr_list[0], gt_list[1], pr_list[1], gt_list[2], pr_list[2],
      exp_base10_t_bf16, mouth_mask, style, pos_style, neg_style)


def video_l1_sum(pairs):
    """sum_i sum(|pred_i - gt_i|) over three (pred, gt) video pairs, one call."""
    p0 = pairs[0][0]
    shape = p0.shape
    for p, g in pairs:
        assert p.shape == shape and g.shape == shape
    n = int(p0.size)

    lanes = next((c for c in (512, 256, 128) if n % c == 0), None)
    if lanes is None:
        # TODO(synk): odd element counts hit a small zero-pad fallback (extra
        # copy); production video shapes (B*3*H*W) are always multiples of 128.
        lanes = 128
        pad = (-n) % lanes
        rows = (n + pad) // lanes
        arrs = [jnp.pad(a.reshape(-1), (0, pad)).reshape(rows, lanes)
                for pr in pairs for a in pr]
    else:
        rows = n // lanes
        arrs = [a.reshape(rows, lanes) for pr in pairs for a in pr]

    itemsize = jnp.dtype(p0.dtype).itemsize
    max_rows = max(8, _VIDEO_TILE_BYTES // (lanes * itemsize))
    block_rows, n_tiles, ragged = _pick_row_tiling(rows, max_rows)

    kernel = functools.partial(_video_l1_kernel, block_rows=block_rows,
                               valid_rows=rows, ragged=ragged)
    in_spec = pl.BlockSpec((block_rows, lanes), lambda i: (i, 0))

    out = pl.pallas_call(
        kernel,
        out_shape=jax.ShapeDtypeStruct((8, n_tiles * 128), jnp.float32),
        grid=(n_tiles,),
        in_specs=[in_spec] * 6,
        out_specs=pl.BlockSpec((8, 128), lambda i: (0, i)),
        compiler_params=pltpu.CompilerParams(
            dimension_semantics=("parallel",),    # per-tile partials -> 2-TC ok
            vmem_limit_bytes=32 * 1024 * 1024),
    )(*arrs)

    # One scalar per tile lives at [0, tile*128 + lane]; reduce outside.
    return jnp.sum(out.reshape(8, n_tiles, 128)[0, :, 0])


# ----------------------------------------------------------------------------
# Module-level wrapper (mirrors Exp3DMMLoss.forward)
# ----------------------------------------------------------------------------

class Exp3DMMLossPallas:
    def __init__(self, config, key, num_vertices=300):
        self.mouth_weight = config['mouth_weight']
        self.exp_weight = config['exp_weight']
        self.triple_weight = config['triple_weight']
        self.rec_weight = config['rec_weight']
        self.distance = config['triple_dis']

        # Deterministic synthetic stand-ins for BFM_model_front.mat contents.
        k_id, k_exp = jax.random.split(key)
        id_base = jax.random.normal(k_id, (num_vertices * 3, 80), jnp.float32) * 0.01
        exp_base = jax.random.normal(k_exp, (num_vertices * 3, 64), jnp.float32) * 0.01
        key_points = jnp.arange(68, dtype=jnp.int32) * 4  # 68 deterministic keypoints

        key_id_base = id_base.reshape(-1, 3, 80)[key_points].reshape(-1, 80)    # (204, 80)
        key_exp_base = exp_base.reshape(-1, 3, 64)[key_points].reshape(-1, 64)  # (204, 64)
        self.key_id_base_t = jnp.asarray(key_id_base.T)    # (80, 204) reference only
        self.key_exp_base_t = jnp.asarray(key_exp_base.T)  # (64, 204) reference only

        # Kernel-side basis: fold the x10 landmark scale in, zero-pad the lane
        # dim 204 -> 256 (zero columns contribute nothing to the sums) and
        # pre-cast to bf16 so the MXU runs at native rate (f32 accumulation).
        base10_t = jnp.pad(self.key_exp_base_t * 10.0, ((0, 0), (0, 256 - 204)))
        self.exp_base10_t = base10_t.astype(jnp.bfloat16)               # (64, 256)
        col = jnp.arange(256)
        self.mouth_mask = ((col >= 144) & (col < 204)).astype(jnp.float32)[None, :]

        self._forward = jax.jit(self._forward_impl)

    def __call__(self, *args):
        return self._forward(*args)

    def _forward_impl(self, exp, pos_exp, neg_exp, style, pos_style, neg_style,
                      video, pos_video, neg_video, data):
        B, win, _ = exp.shape
        N = B * win

        gt_list = [data['gt_3dmm'].reshape(N, 64),
                   data['neg_gt_3dmm'].reshape(N, 64),
                   data['pos_gt_3dmm'].reshape(N, 64)]
        pr_list = [exp.reshape(N, 64),
                   neg_exp.reshape(N, 64),
                   pos_exp.reshape(N, 64)]

        sums = fused_small_losses(gt_list, pr_list, self.exp_base10_t,
                                  self.mouth_mask, style, pos_style, neg_style)

        # Per-prefix shapes are identical, so sum-of-means == total_sum / count.
        loss_mouth = self.mouth_weight[0] * sums[0] / (N * 20 * 3)
        loss_exp = (self.exp_weight[0] * sums[1] / (N * 48 * 3)
                    + self.exp_weight[1] * sums[2] / (N * 64))

        triple_loss = self.triple_weight * jax.nn.relu(
            (sums[3] - sums[4]) / style.size + self.distance)

        # TODO(synk): RenderLoss.api_forward_for_exp_3dmm is approximated as a
        # mean-L1 reconstruction loss (its perceptual/VGG terms are not
        # reproducible without the RenderLoss definition).
        l1_total = video_l1_sum([(video, data['gt_video']),
                                 (neg_video, data['neg_gt_video']),
                                 (pos_video, data['pos_gt_video'])])
        rec_loss = self.rec_weight * l1_total / video.size

        return loss_mouth + loss_exp + triple_loss + rec_loss


# ----------------------------------------------------------------------------
# Pure-JAX reference (uses the full id+exp reconstruction to validate the
# algebraic cancellation used inside the kernel)
# ----------------------------------------------------------------------------

def reference_loss(module, exp, pos_exp, neg_exp, style, pos_style, neg_style,
                   video, pos_video, neg_video, data):
    id_base = module.key_id_base_t.T    # (204, 80)
    exp_base = module.key_exp_base_t.T  # (204, 64)

    def reconstruct(id_coeff, exp_coeff):
        face = (jnp.einsum('bwc,nc->bwn', id_coeff, id_base)
                + jnp.einsum('bwc,nc->bwn', exp_coeff, exp_base))
        B, win, _ = face.shape
        return face.reshape(B, win, 68, 3) * 10.0

    predict = {'exp': exp, 'neg_exp': neg_exp, 'pos_exp': pos_exp,
               'video': video, 'neg_video': neg_video, 'pos_video': pos_video}
    loss_mouth = 0.0
    loss_exp = 0.0
    rec_loss = 0.0
    for t in ['', 'neg_', 'pos_']:
        gt_lm = reconstruct(data[f'{t}id_3dmm'], data[f'{t}gt_3dmm'])
        pr_lm = reconstruct(data[f'{t}id_3dmm'], predict[f'{t}exp'])
        loss_mouth = loss_mouth + module.mouth_weight[0] * jnp.mean(
            (gt_lm[:, :, 48:] - pr_lm[:, :, 48:]) ** 2)
        loss_exp = (loss_exp
                    + module.exp_weight[0] * jnp.mean((gt_lm[:, :, :48] - pr_lm[:, :, :48]) ** 2)
                    + module.exp_weight[1] * jnp.mean(
                        jnp.abs(predict[f'{t}exp'] - data[f'{t}gt_3dmm'])))
        rec_loss = rec_loss + module.rec_weight * jnp.mean(
            jnp.abs(predict[f'{t}video'] - data[f'{t}gt_video']))
    triple = module.triple_weight * jax.nn.relu(
        jnp.mean((style - pos_style) ** 2) - jnp.mean((style - neg_style) ** 2)
        + module.distance)
    return loss_mouth + loss_exp + triple + rec_loss


# ----------------------------------------------------------------------------
# Main
# ----------------------------------------------------------------------------

if __name__ == "__main__":
    config = {
        'mouth_weight': [2.0],
        'exp_weight': [1.0, 0.5],
        'triple_weight': 1.0,
        'rec_weight': 0.5,
        'triple_dis': 0.2,
    }

    B, WIN, H, W, STYLE_DIM = 2, 8, 16, 16, 32

    root = jax.random.PRNGKey(0)
    k_module, k_data = jax.random.split(root)
    module = Exp3DMMLossPallas(config, k_module)

    keys = jax.random.split(k_data, 32)
    ki = iter(keys)

    def rnd(shape):
        return jax.random.normal(next(ki), shape, jnp.float32)

    exp = rnd((B, WIN, 64));      pos_exp = rnd((B, WIN, 64));  neg_exp = rnd((B, WIN, 64))
    style = rnd((B, STYLE_DIM));  pos_style = rnd((B, STYLE_DIM)); neg_style = rnd((B, STYLE_DIM))
    video = rnd((B, 3, H, W));    pos_video = rnd((B, 3, H, W)); neg_video = rnd((B, 3, H, W))

    data = {}
    for t in ['', 'pos_', 'neg_']:
        data[f'{t}id_3dmm'] = rnd((B, WIN, 80))
        data[f'{t}gt_3dmm'] = rnd((B, WIN, 64))
        data[f'{t}gt_video'] = rnd((B, 3, H, W))

    out = module(exp, pos_exp, neg_exp, style, pos_style, neg_style,
                 video, pos_video, neg_video, data)
    out = jax.block_until_ready(out)

    ref = jax.block_until_ready(
        reference_loss(module, exp, pos_exp, neg_exp, style, pos_style, neg_style,
                       video, pos_video, neg_video, data))

    assert jnp.isfinite(out), "non-finite loss"
    assert jnp.allclose(out, ref, rtol=1e-2, atol=1e-2), (out, ref)
    print("KERNEL_OK")
</pallas_src>

<mosaic_0001>
module attributes {stable_mosaic.version = 11 : i64} {
  func.func @_video_l1_kernel(%arg0: i32, %arg1: memref<3x512xf32, #tpu.memory_space<vmem>>, %arg2: memref<3x512xf32, #tpu.memory_space<vmem>>, %arg3: memref<3x512xf32, #tpu.memory_space<vmem>>, %arg4: memref<3x512xf32, #tpu.memory_space<vmem>>, %arg5: memref<3x512xf32, #tpu.memory_space<vmem>>, %arg6: memref<3x512xf32, #tpu.memory_space<vmem>>, %arg7: memref<8x128xf32, #tpu.memory_space<vmem>>) attributes {dimension_semantics = [#tpu.dimension_semantics<parallel>], iteration_bounds = array<i64: 1>, scalar_prefetch = 0 : i64, scratch_operands = 0 : i64, tpu.core_type = #tpu.core_type<tc>, window_params = [{transform_indices = @transform_0, window_bounds = array<i64: 3, 512>}, {transform_indices = @transform_1, window_bounds = array<i64: 3, 512>}, {transform_indices = @transform_2, window_bounds = array<i64: 3, 512>}, {transform_indices = @transform_3, window_bounds = array<i64: 3, 512>}, {transform_indices = @transform_4, window_bounds = array<i64: 3, 512>}, {transform_indices = @transform_5, window_bounds = array<i64: 3, 512>}, {transform_indices = @transform_6, window_bounds = array<i64: 8, 128>}]} {
    %c0 = arith.constant 0 : index
    %c0_0 = arith.constant 0 : index
    %0 = vector.load %arg1[%c0, %c0_0] : memref<3x512xf32, #tpu.memory_space<vmem>>, vector<3x512xf32>
    %c0_1 = arith.constant 0 : index
    %c0_2 = arith.constant 0 : index
    %1 = vector.load %arg2[%c0_1, %c0_2] : memref<3x512xf32, #tpu.memory_space<vmem>>, vector<3x512xf32>
    %2 = arith.subf %0, %1 : vector<3x512xf32>
    %3 = math.absf %2 : vector<3x512xf32>
    %c0_3 = arith.constant 0 : index
    %c0_4 = arith.constant 0 : index
    %4 = vector.load %arg3[%c0_3, %c0_4] : memref<3x512xf32, #tpu.memory_space<vmem>>, vector<3x512xf32>
    %c0_5 = arith.constant 0 : index
    %c0_6 = arith.constant 0 : index
    %5 = vector.load %arg4[%c0_5, %c0_6] : memref<3x512xf32, #tpu.memory_space<vmem>>, vector<3x512xf32>
    %6 = arith.subf %4, %5 : vector<3x512xf32>
    %7 = math.absf %6 : vector<3x512xf32>
    %8 = arith.addf %3, %7 : vector<3x512xf32>
    %c0_7 = arith.constant 0 : index
    %c0_8 = arith.constant 0 : index
    %9 = vector.load %arg5[%c0_7, %c0_8] : memref<3x512xf32, #tpu.memory_space<vmem>>, vector<3x512xf32>
    %c0_9 = arith.constant 0 : index
    %c0_10 = arith.constant 0 : index
    %10 = vector.load %arg6[%c0_9, %c0_10] : memref<3x512xf32, #tpu.memory_space<vmem>>, vector<3x512xf32>
    %11 = arith.subf %9, %10 : vector<3x512xf32>
    %12 = math.absf %11 : vector<3x512xf32>
    %13 = arith.addf %8, %12 : vector<3x512xf32>
    %14 = vector.shape_cast %13 : vector<3x512xf32> to vector<1x3x512xf32>
    %cst = arith.constant dense<0.000000e+00> : vector<1xf32>
    %15 = vector.multi_reduction <add>, %14, %cst [1, 2] : vector<1x3x512xf32> to vector<1xf32>
    %16 = vector.shape_cast %15 : vector<1xf32> to vector<1x1x1xf32>
    %17 = vector.extract %16[0, 0, 0] : f32 from vector<1x1x1xf32>
    %cst_11 = arith.constant 0.000000e+00 : f32
    %18 = vector.broadcast %cst_11 : f32 to vector<8x128xf32>
    %19 = vector.broadcast %17 : f32 to vector<8x128xf32>
    %20 = arith.addf %18, %19 : vector<8x128xf32>
    %c0_12 = arith.constant 0 : index
    %c0_13 = arith.constant 0 : index
    %21 = vector.load %arg7[%c0_12, %c0_13] : memref<8x128xf32, #tpu.memory_space<vmem>>, vector<8x128xf32>
    tpu.vector_store %arg7[%c0_12, %c0_13], %20 {strides = array<i32>} : memref<8x128xf32, #tpu.memory_space<vmem>>, vector<8x128xf32>,
    return
  }
  func.func @transform_0(%arg0: i32) -> (i32, i32) {
    %c0_i32 = arith.constant 0 : i32
    %c0_i32_0 = arith.constant 0 : i32
    return %arg0, %c0_i32 : i32, i32
  }
  func.func @transform_1(%arg0: i32) -> (i32, i32) {
    %c0_i32 = arith.constant 0 : i32
    %c0_i32_0 = arith.constant 0 : i32
    return %arg0, %c0_i32 : i32, i32
  }
  func.func @transform_2(%arg0: i32) -> (i32, i32) {
    %c0_i32 = arith.constant 0 : i32
    %c0_i32_0 = arith.constant 0 : i32
    return %arg0, %c0_i32 : i32, i32
  }
  func.func @transform_3(%arg0: i32) -> (i32, i32) {
    %c0_i32 = arith.constant 0 : i32
    %c0_i32_0 = arith.constant 0 : i32
    return %arg0, %c0_i32 : i32, i32
  }
  func.func @transform_4(%arg0: i32) -> (i32, i32) {
    %c0_i32 = arith.constant 0 : i32
    %c0_i32_0 = arith.constant 0 : i32
    return %arg0, %c0_i32 : i32, i32
  }
  func.func @transform_5(%arg0: i32) -> (i32, i32) {
    %c0_i32 = arith.constant 0 : i32
    %c0_i32_0 = arith.constant 0 : i32
    return %arg0, %c0_i32 : i32, i32
  }
  func.func @transform_6(%arg0: i32) -> (i32, i32) {
    %c0_i32 = arith.constant 0 : i32
    %c0_i32_0 = arith.constant 0 : i32
    return %c0_i32, %arg0 : i32, i32
  }
}

module attributes {stable_mosaic.version = 11 : i64} {
  func.func @_fused_small_kernel(%arg0: i32, %arg1: memref<16x64xf32, #tpu.memory_space<vmem>>, %arg2: memref<16x64xf32, #tpu.memory_space<vmem>>, %arg3: memref<16x64xf32, #tpu.memory_space<vmem>>, %arg4: memref<16x64xf32, #tpu.memory_space<vmem>>, %arg5: memref<16x64xf32, #tpu.memory_space<vmem>>, %arg6: memref<16x64xf32, #tpu.memory_space<vmem>>, %arg7: memref<64x256xbf16, #tpu.memory_space<vmem>>, %arg8: memref<1x256xf32, #tpu.memory_space<vmem>>, %arg9: memref<2x32xf32, #tpu.memory_space<vmem>>, %arg10: memref<2x32xf32, #tpu.memory_space<vmem>>, %arg11: memref<2x32xf32, #tpu.memory_space<vmem>>, %arg12: memref<5xf32, #tpu.memory_space<smem>>) attributes {dimension_semantics = [#tpu.dimension_semantics<arbitrary>], iteration_bounds = array<i64: 1>, scalar_prefetch = 0 : i64, scratch_operands = 0 : i64, tpu.core_type = #tpu.core_type<tc>, window_params = [{transform_indices = @transform_0, window_bounds = array<i64: 16, 64>}, {transform_indices = @transform_1, window_bounds = array<i64: 16, 64>}, {transform_indices = @transform_2, window_bounds = array<i64: 16, 64>}, {transform_indices = @transform_3, window_bounds = array<i64: 16, 64>}, {transform_indices = @transform_4, window_bounds = array<i64: 16, 64>}, {transform_indices = @transform_5, window_bounds = array<i64: 16, 64>}, {pipeline_mode = #tpu.pipeline_mode<synchronous>, transform_indices = @transform_6, window_bounds = array<i64: 64, 256>}, {pipeline_mode = #tpu.pipeline_mode<synchronous>, transform_indices = @transform_7, window_bounds = array<i64: 1, 256>}, {pipeline_mode = #tpu.pipeline_mode<synchronous>, transform_indices = @transform_8, window_bounds = array<i64: 2, 32>}, {pipeline_mode = #tpu.pipeline_mode<synchronous>, transform_indices = @transform_9, window_bounds = array<i64: 2, 32>}, {pipeline_mode = #tpu.pipeline_mode<synchronous>, transform_indices = @transform_10, window_bounds = array<i64: 2, 32>}, {transform_indices = @transform_11, window_bounds = array<i64: 5>}]} {
    %c0 = arith.constant 0 : index
    %c0_0 = arith.constant 0 : index
    %0 = vector.load %arg7[%c0, %c0_0] : memref<64x256xbf16, #tpu.memory_space<vmem>>, vector<64x256xbf16>
    %c0_1 = arith.constant 0 : index
    %c0_2 = arith.constant 0 : index
    %1 = vector.load %arg8[%c0_1, %c0_2] : memref<1x256xf32, #tpu.memory_space<vmem>>, vector<1x256xf32>
    %c0_3 = arith.constant 0 : index
    %c0_4 = arith.constant 0 : index
    %2 = vector.load %arg1[%c0_3, %c0_4] : memref<16x64xf32, #tpu.memory_space<vmem>>, vector<16x64xf32>
    %c0_5 = arith.constant 0 : index
    %c0_6 = arith.constant 0 : index
    %3 = vector.load %arg2[%c0_5, %c0_6] : memref<16x64xf32, #tpu.memory_space<vmem>>, vector<16x64xf32>
    %4 = arith.subf %2, %3 : vector<16x64xf32>
    %5 = arith.truncf %4 : vector<16x64xf32> to vector<16x64xbf16>
    %cst = arith.constant dense<0.000000e+00> : vector<16x256xf32>
    %6 = tpu.matmul %5, %0, %cst {dimension_numbers = #tpu.dot_dimension_numbers<[1], [0], [0], [1], [0, 0, 1, 1], [], []>} : vector<16x64xbf16>, vector<64x256xbf16>, vector<16x256xf32> -> vector<16x256xf32>
    %7 = arith.mulf %6, %6 : vector<16x256xf32>
    %8 = vector.shape_cast %7 : vector<16x256xf32> to vector<1x16x256xf32>
    %cst_7 = arith.constant dense<0.000000e+00> : vector<1xf32>
    %9 = vector.multi_reduction <add>, %8, %cst_7 [1, 2] : vector<1x16x256xf32> to vector<1xf32>
    %10 = vector.shape_cast %9 : vector<1xf32> to vector<1x1x1xf32>
    %11 = vector.extract %10[0, 0, 0] : f32 from vector<1x1x1xf32>
    %cst_8 = arith.constant 0.000000e+00 : f32
    %12 = arith.addf %cst_8, %11 : f32
    %13 = vector.broadcast %1 : vector<1x256xf32> to vector<16x256xf32>
    %14 = arith.mulf %7, %13 : vector<16x256xf32>
    %15 = vector.shape_cast %14 : vector<16x256xf32> to vector<1x16x256xf32>
    %cst_9 = arith.constant dense<0.000000e+00> : vector<1xf32>
    %16 = vector.multi_reduction <add>, %15, %cst_9 [1, 2] : vector<1x16x256xf32> to vector<1xf32>
    %17 = vector.shape_cast %16 : vector<1xf32> to vector<1x1x1xf32>
    %18 = vector.extract %17[0, 0, 0] : f32 from vector<1x1x1xf32>
    %cst_10 = arith.constant 0.000000e+00 : f32
    %19 = arith.addf %cst_10, %18 : f32
    %20 = math.absf %4 : vector<16x64xf32>
    %21 = vector.shape_cast %20 : vector<16x64xf32> to vector<1x16x64xf32>
    %cst_11 = arith.constant dense<0.000000e+00> : vector<1xf32>
    %22 = vector.multi_reduction <add>, %21, %cst_11 [1, 2] : vector<1x16x64xf32> to vector<1xf32>
    %23 = vector.shape_cast %22 : vector<1xf32> to vector<1x1x1xf32>
    %24 = vector.extract %23[0, 0, 0] : f32 from vector<1x1x1xf32>
    %cst_12 = arith.constant 0.000000e+00 : f32
    %25 = arith.addf %cst_12, %24 : f32
    %c0_13 = arith.constant 0 : index
    %c0_14 = arith.constant 0 : index
    %26 = vector.load %arg3[%c0_13, %c0_14] : memref<16x64xf32, #tpu.memory_space<vmem>>, vector<16x64xf32>
    %c0_15 = arith.constant 0 : index
    %c0_16 = arith.constant 0 : index
    %27 = vector.load %arg4[%c0_15, %c0_16] : memref<16x64xf32, #tpu.memory_space<vmem>>, vector<16x64xf32>
    %28 = arith.subf %26, %27 : vector<16x64xf32>
    %29 = arith.truncf %28 : vector<16x64xf32> to vector<16x64xbf16>
    %cst_17 = arith.constant dense<0.000000e+00> : vector<16x256xf32>
    %30 = tpu.matmul %29, %0, %cst_17 {dimension_numbers = #tpu.dot_dimension_numbers<[1], [0], [0], [1], [0, 0, 1, 1], [], []>} : vector<16x64xbf16>, vector<64x256xbf16>, vector<16x256xf32> -> vector<16x256xf32>
    %31 = arith.mulf %30, %30 : vector<16x256xf32>
    %32 = vector.shape_cast %31 : vector<16x256xf32> to vector<1x16x256xf32>
    %cst_18 = arith.constant dense<0.000000e+00> : vector<1xf32>
    %33 = vector.multi_reduction <add>, %32, %cst_18 [1, 2] : vector<1x16x256xf32> to vector<1xf32>
    %34 = vector.shape_cast %33 : vector<1xf32> to vector<1x1x1xf32>
    %35 = vector.extract %34[0, 0, 0] : f32 from vector<1x1x1xf32>
    %36 = arith.addf %12, %35 : f32
    %37 = vector.broadcast %1 : vector<1x256xf32> to vector<16x256xf32>
    %38 = arith.mulf %31, %37 : vector<16x256xf32>
    %39 = vector.shape_cast %38 : vector<16x256xf32> to vector<1x16x256xf32>
    %cst_19 = arith.constant dense<0.000000e+00> : vector<1xf32>
    %40 = vector.multi_reduction <add>, %39, %cst_19 [1, 2] : vector<1x16x256xf32> to vector<1xf32>
    %41 = vector.shape_cast %40 : vector<1xf32> to vector<1x1x1xf32>
    %42 = vector.extract %41[0, 0, 0] : f32 from vector<1x1x1xf32>
    %43 = arith.addf %19, %42 : f32
    %44 = math.absf %28 : vector<16x64xf32>
    %45 = vector.shape_cast %44 : vector<16x64xf32> to vector<1x16x64xf32>
    %cst_20 = arith.constant dense<0.000000e+00> : vector<1xf32>
    %46 = vector.multi_reduction <add>, %45, %cst_20 [1, 2] : vector<1x16x64xf32> to vector<1xf32>
    %47 = vector.shape_cast %46 : vector<1xf32> to vector<1x1x1xf32>
    %48 = vector.extract %47[0, 0, 0] : f32 from vector<1x1x1xf32>
    %49 = arith.addf %25, %48 : f32
    %c0_21 = arith.constant 0 : index
    %c0_22 = arith.constant 0 : index
    %50 = vector.load %arg5[%c0_21, %c0_22] : memref<16x64xf32, #tpu.memory_space<vmem>>, vector<16x64xf32>
    %c0_23 = arith.constant 0 : index
    %c0_24 = arith.constant 0 : index
    %51 = vector.load %arg6[%c0_23, %c0_24] : memref<16x64xf32, #tpu.memory_space<vmem>>, vector<16x64xf32>
    %52 = arith.subf %50, %51 : vector<16x64xf32>
    %53 = arith.truncf %52 : vector<16x64xf32> to vector<16x64xbf16>
    %cst_25 = arith.constant dense<0.000000e+00> : vector<16x256xf32>
    %54 = tpu.matmul %53, %0, %cst_25 {dimension_numbers = #tpu.dot_dimension_numbers<[1], [0], [0], [1], [0, 0, 1, 1], [], []>} : vector<16x64xbf16>, vector<64x256xbf16>, vector<16x256xf32> -> vector<16x256xf32>
    %55 = arith.mulf %54, %54 : vector<16x256xf32>
    %56 = vector.shape_cast %55 : vector<16x256xf32> to vector<1x16x256xf32>
    %cst_26 = arith.constant dense<0.000000e+00> : vector<1xf32>
    %57 = vector.multi_reduction <add>, %56, %cst_26 [1, 2] : vector<1x16x256xf32> to vector<1xf32>
    %58 = vector.shape_cast %57 : vector<1xf32> to vector<1x1x1xf32>
    %59 = vector.extract %58[0, 0, 0] : f32 from vector<1x1x1xf32>
    %60 = arith.addf %36, %59 : f32
    %61 = vector.broadcast %1 : vector<1x256xf32> to vector<16x256xf32>
    %62 = arith.mulf %55, %61 : vector<16x256xf32>
    %63 = vector.shape_cast %62 : vector<16x256xf32> to vector<1x16x256xf32>
    %cst_27 = arith.constant dense<0.000000e+00> : vector<1xf32>
    %64 = vector.multi_reduction <add>, %63, %cst_27 [1, 2] : vector<1x16x256xf32> to vector<1xf32>
    %65 = vector.shape_cast %64 : vector<1xf32> to vector<1x1x1xf32>
    %66 = vector.extract %65[0, 0, 0] : f32 from vector<1x1x1xf32>
    %67 = arith.addf %43, %66 : f32
    %68 = math.absf %52 : vector<16x64xf32>
    %69 = vector.shape_cast %68 : vector<16x64xf32> to vector<1x16x64xf32>
    %cst_28 = arith.constant dense<0.000000e+00> : vector<1xf32>
    %70 = vector.multi_reduction <add>, %69, %cst_28 [1, 2] : vector<1x16x64xf32> to vector<1xf32>
    %71 = vector.shape_cast %70 : vector<1xf32> to vector<1x1x1xf32>
    %72 = vector.extract %71[0, 0, 0] : f32 from vector<1x1x1xf32>
    %73 = arith.addf %49, %72 : f32
    %c0_i32 = arith.constant 0 : i32
    %74 = arith.cmpi eq, %arg0, %c0_i32 : i32
    %75 = arith.extui %74 : i1 to i32
    %c0_i32_29 = arith.constant 0 : i32
    %76 = arith.cmpi ne, %75, %c0_i32_29 : i32
    scf.if %76 {
      %cst_34 = arith.constant 0.000000e+00 : f32
      %c0_35 = arith.constant 0 : index
      %87 = memref.load %arg12[%c0_35] : memref<5xf32, #tpu.memory_space<smem>>
      memref.store %cst_34, %arg12[%c0_35] : memref<5xf32, #tpu.memory_space<smem>>
      %cst_36 = arith.constant 0.000000e+00 : f32
      %c1_37 = arith.constant 1 : index
      %88 = memref.load %arg12[%c1_37] : memref<5xf32, #tpu.memory_space<smem>>
      memref.store %cst_36, %arg12[%c1_37] : memref<5xf32, #tpu.memory_space<smem>>
      %cst_38 = arith.constant 0.000000e+00 : f32
      %c2_39 = arith.constant 2 : index
      %89 = memref.load %arg12[%c2_39] : memref<5xf32, #tpu.memory_space<smem>>
      memref.store %cst_38, %arg12[%c2_39] : memref<5xf32, #tpu.memory_space<smem>>
      %c0_40 = arith.constant 0 : index
      %c0_41 = arith.constant 0 : index
      %90 = vector.load %arg9[%c0_40, %c0_41] : memref<2x32xf32, #tpu.memory_space<vmem>>, vector<2x32xf32>
      %c0_42 = arith.constant 0 : index
      %c0_43 = arith.constant 0 : index
      %91 = vector.load %arg10[%c0_42, %c0_43] : memref<2x32xf32, #tpu.memory_space<vmem>>, vector<2x32xf32>
      %92 = arith.subf %90, %91 : vector<2x32xf32>
      %c0_44 = arith.constant 0 : index
      %c0_45 = arith.constant 0 : index
      %93 = vector.load %arg9[%c0_44, %c0_45] : memref<2x32xf32, #tpu.memory_space<vmem>>, vector<2x32xf32>
      %c0_46 = arith.constant 0 : index
      %c0_47 = arith.constant 0 : index
      %94 = vector.load %arg11[%c0_46, %c0_47] : memref<2x32xf32, #tpu.memory_space<vmem>>, vector<2x32xf32>
      %95 = arith.subf %93, %94 : vector<2x32xf32>
      %96 = arith.mulf %92, %92 : vector<2x32xf32>
      %97 = vector.shape_cast %96 : vector<2x32xf32> to vector<1x2x32xf32>
      %cst_48 = arith.constant dense<0.000000e+00> : vector<1xf32>
      %98 = vector.multi_reduction <add>, %97, %cst_48 [1, 2] : vector<1x2x32xf32> to vector<1xf32>
      %99 = vector.shape_cast %98 : vector<1xf32> to vector<1x1x1xf32>
      %100 = vector.extract %99[0, 0, 0] : f32 from vector<1x1x1xf32>
      %c3 = arith.constant 3 : index
      %101 = memref.load %arg12[%c3] : memref<5xf32, #tpu.memory_space<smem>>
      memref.store %100, %arg12[%c3] : memref<5xf32, #tpu.memory_space<smem>>
      %102 = arith.mulf %95, %95 : vector<2x32xf32>
      %103 = vector.shape_cast %102 : vector<2x32xf32> to vector<1x2x32xf32>
      %cst_49 = arith.constant dense<0.000000e+00> : vector<1xf32>
      %104 = vector.multi_reduction <add>, %103, %cst_49 [1, 2] : vector<1x2x32xf32> to vector<1xf32>
      %105 = vector.shape_cast %104 : vector<1xf32> to vector<1x1x1xf32>
      %106 = vector.extract %105[0, 0, 0] : f32 from vector<1x1x1xf32>
      %c4 = arith.constant 4 : index
      %107 = memref.load %arg12[%c4] : memref<5xf32, #tpu.memory_space<smem>>
      memref.store %106, %arg12[%c4] : memref<5xf32, #tpu.memory_space<smem>>
    } else {
    }
    %c0_30 = arith.constant 0 : index
    %77 = memref.load %arg12[%c0_30] : memref<5xf32, #tpu.memory_space<smem>>
    %78 = arith.addf %77, %67 : f32
    %c0_31 = arith.constant 0 : index
    %79 = memref.load %arg12[%c0_31] : memref<5xf32, #tpu.memory_space<smem>>
    memref.store %78, %arg12[%c0_31] : memref<5xf32, #tpu.memory_space<smem>>
    %c1 = arith.constant 1 : index
    %80 = memref.load %arg12[%c1] : memref<5xf32, #tpu.memory_space<smem>>
    %81 = arith.subf %60, %67 : f32
    %82 = arith.addf %80, %81 : f32
    %c1_32 = arith.constant 1 : index
    %83 = memref.load %arg12[%c1_32] : memref<5xf32, #tpu.memory_space<smem>>
    memref.store %82, %arg12[%c1_32] : memref<5xf32, #tpu.memory_space<smem>>
    %c2 = arith.constant 2 : index
    %84 = memref.load %arg12[%c2] : memref<5xf32, #tpu.memory_space<smem>>
    %85 = arith.addf %84, %73 : f32
    %c2_33 = arith.constant 2 : index
    %86 = memref.load %arg12[%c2_33] : memref<5xf32, #tpu.memory_space<smem>>
    memref.store %85, %arg12[%c2_33] : memref<5xf32, #tpu.memory_space<smem>>
    return
  }
  func.func @transform_0(%arg0: i32) -> (i32, i32) {
    %c0_i32 = arith.constant 0 : i32
    %c0_i32_0 = arith.constant 0 : i32
    return %arg0, %c0_i32 : i32, i32
  }
  func.func @transform_1(%arg0: i32) -> (i32, i32) {
    %c0_i32 = arith.constant 0 : i32
    %c0_i32_0 = arith.constant 0 : i32
    return %arg0, %c0_i32 : i32, i32
  }
  func.func @transform_2(%arg0: i32) -> (i32, i32) {
    %c0_i32 = arith.constant 0 : i32
    %c0_i32_0 = arith.constant 0 : i32
    return %arg0, %c0_i32 : i32, i32
  }
  func.func @transform_3(%arg0: i32) -> (i32, i32) {
    %c0_i32 = arith.constant 0 : i32
    %c0_i32_0 = arith.constant 0 : i32
    return %arg0, %c0_i32 : i32, i32
  }
  func.func @transform_4(%arg0: i32) -> (i32, i32) {
    %c0_i32 = arith.constant 0 : i32
    %c0_i32_0 = arith.constant 0 : i32
    return %arg0, %c0_i32 : i32, i32
  }
  func.func @transform_5(%arg0: i32) -> (i32, i32) {
    %c0_i32 = arith.constant 0 : i32
    %c0_i32_0 = arith.constant 0 : i32
    return %arg0, %c0_i32 : i32, i32
  }
  func.func @transform_6(%arg0: i32) -> (i32, i32) {
    %c0_i32 = arith.constant 0 : i32
    %c0_i32_0 = arith.constant 0 : i32
    %c0_i32_1 = arith.constant 0 : i32
    return %c0_i32, %c0_i32_0 : i32, i32
  }
  func.func @transform_7(%arg0: i32) -> (i32, i32) {
    %c0_i32 = arith.constant 0 : i32
    %c0_i32_0 = arith.constant 0 : i32
    %c0_i32_1 = arith.constant 0 : i32
    return %c0_i32, %c0_i32_0 : i32, i32
  }
  func.func @transform_8(%arg0: i32) -> (i32, i32) {
    %c0_i32 = arith.constant 0 : i32
    %c0_i32_0 = arith.constant 0 : i32
    %c0_i32_1 = arith.constant 0 : i32
    return %c0_i32, %c0_i32_0 : i32, i32
  }
  func.func @transform_9(%arg0: i32) -> (i32, i32) {
    %c0_i32 = arith.constant 0 : i32
    %c0_i32_0 = arith.constant 0 : i32
    %c0_i32_1 = arith.constant 0 : i32
    return %c0_i32, %c0_i32_0 : i32, i32
  }
  func.func @transform_10(%arg0: i32) -> (i32, i32) {
    %c0_i32 = arith.constant 0 : i32
    %c0_i32_0 = arith.constant 0 : i32
    %c0_i32_1 = arith.constant 0 : i32
    return %c0_i32, %c0_i32_0 : i32, i32
  }
  func.func @transform_11(%arg0: i32) -> i32 {
    %c0_i32 = arith.constant 0 : i32
    %c0_i32_0 = arith.constant 0 : i32
    return %c0_i32 : i32
  }
}

</mosaic_0001>

<bundles_post_ra>
// kernel: _forward_impl.3
= control target key start
LH: loop header
LB: loop body
LE: loop exit
PB: predicated region body
PF: predicated region fallthrough
CT: control target
= control target key end

     0   :  { %vm57_vm0 = vcmask 1042432   ;;  %s157_s0 = inlined_call_operand.vmem [shape: f32[3,512], index: 0, kind: input, shape index: {}]   ;;  %s158_s1 = inlined_call_operand.vmem [shape: f32[3,512], index: 1, kind: input, shape index: {}]   ;;  %s159_s2 = inlined_call_operand.vmem [shape: f32[3,512], index: 2, kind: input, shape index: {}]   ;;  %s160_s3 = inlined_call_operand.vmem [shape: f32[3,512], index: 3, kind: input, shape index: {}]   ;;  %s161_s4 = inlined_call_operand.vmem [shape: f32[3,512], index: 4, kind: input, shape index: {}]   ;;  %s162_s5 = inlined_call_operand.vmem [shape: f32[3,512], index: 5, kind: input, shape index: {}]   ;;  %s163_s6 = inlined_call_operand.vmem [shape: f32[8,128], index: 6, kind: output, shape index: {}]  }
   0x1   :  { %v23_v0 = vld [vmem:[%s157_s0] sm:$0x77]  ;;  %v24_v1 = vld [vmem:[%s157_s0 + $0x8] sm:$0x77] }
   0x2   :  { %v25_v2 = vld [vmem:[%s158_s1] sm:$0x77]  ;;  %v26_v3 = vld [vmem:[%s158_s1 + $0x8] sm:$0x77] }
   0x3   :  { %v27_v4 = vsub.f32 %v23_v0, %v25_v2  ;;  %v31_v5 = vld [vmem:[%s159_s2] sm:$0x77]  ;;  %v32_v6 = vld [vmem:[%s159_s2 + $0x8] sm:$0x77]  ;;  %v28_v7 = vsub.f32 %v24_v1, %v26_v3 }
   0x4   :  { %v33_v8 = vld [vmem:[%s160_s3] sm:$0x77]  ;;  %v34_v9 = vld [vmem:[%s160_s3 + $0x8] sm:$0x77] }
   0x5   :  { %v41_v10 = vld [vmem:[%s161_s4] sm:$0x77]  ;;  %v29_v11 = vand.u32 2147483647, %v27_v4  ;;  %v35_v12 = vsub.f32 %v31_v5, %v33_v8  ;;  %v36_v13 = vsub.f32 %v32_v6, %v34_v9  ;;  %v42_v14 = vld [vmem:[%s161_s4 + $0x8] sm:$0x77] }
   0x6   :  { %v43_v15 = vld [vmem:[%s162_s5] sm:$0x77]  ;;  %v30_v16 = vand.u32 2147483647, %v28_v7  ;;  %v44_v17 = vld [vmem:[%s162_s5 + $0x8] sm:$0x77] }
   0x7   :  { %v45_v18 = vsub.f32 %v41_v10, %v43_v15  ;;  %v37_v19 = vand.u32 2147483647, %v35_v12  ;;  %v38_v20 = vand.u32 2147483647, %v36_v13  ;;  %v46_v21 = vsub.f32 %v42_v14, %v44_v17 }
   0x9   :  { %v47_v22 = vand.u32 2147483647, %v45_v18  ;;  %v39_v23 = vadd.f32 %v37_v19, %v29_v11  ;;  %v40_v24 = vadd.f32 %v38_v20, %v30_v16  ;;  %v48_v25 = vand.u32 2147483647, %v46_v21 }
   0xb   :  { %v49_v26 = vadd.f32 %v47_v22, %v39_v23  ;;  %v50_v27 = vadd.f32 %v48_v25, %v40_v24 }
   0xd   :  { %v53_v28 = vcombine.high %v49_v26, %v49_v26  ;;  %v54_v29 = vcombine.high %v50_v27, %v50_v27  ;;  %v58_v30 = vsel %vm57_vm0, %v49_v26, 0.0  ;;  %v61_v32 = vsel %vm57_vm0, %v50_v27, 0.0 }
   0xf   :  { %v59_v31 = vsel %vm57_vm0, %v53_v28, 0.0  ;;  %v63_v34 = vsel %vm57_vm0, %v54_v29, 0.0 }
  0x10   :  { %v60_v33 = vadd.f32 %v59_v31, %v58_v30 }
  0x12   :  { %v62_v35 = vadd.f32 %v61_v32, %v60_v33 }
  0x14   :  { %v64_v36 = vadd.f32 %v63_v34, %v62_v35 }
  0x16   :  { %65 = vadd.xlane.f32.xlu0 %v64_v36 }
  0x9f   :  { %v66_v37 = vpop.xlane.xlu0 %65 }
  0xa0   :  { %v67_v38 = vrot.slane %v66_v37, 4 }
  0xa2   :  { %v68_v39 = vadd.f32 %v67_v38, %v66_v37 }
  0xa4   :  { %v69_v40 = vrot.slane %v68_v39, 2 }
  0xa6   :  { %v70_v41 = vadd.f32 %v69_v40, %v68_v39 }
  0xa8   :  { %v71_v42 = vrot.slane %v70_v41, 1 }
  0xaa   :  { %v72_v43 = vadd.f32 %v71_v42, %v70_v41 }
  0xac   :  { %81 = vpush %v72_v43 }
  0xdd   :  { %s82_s3 = spop %81 }
  0xde   :  { %v74_v44 = vstv %s82_s3 }
  0xdf   :  { %76 = vst [vmem:[%s163_s6] sm:$0xff] %v74_v44 }

// kernel: _forward_impl.2
= control target key start
LH: loop header
LB: loop body
LE: loop exit
PB: predicated region body
PF: predicated region fallthrough
CT: control target
= control target key end

     0   :  { %16 = vsyncpa [#allocation3], 0  ;;  %s975_s0 = inlined_call_operand.vmem [shape: f32[16,64], index: 0, kind: input, shape index: {}]   ;;  %s976_s1 = inlined_call_operand.hbm [shape: f32[16,64], index: 1, kind: input, shape index: {}]   ;;  %s977_s2 = inlined_call_operand.hbm [shape: f32[16,64], index: 2, kind: input, shape index: {}]   ;;  %s978_s3 = inlined_call_operand.hbm [shape: f32[16,64], index: 3, kind: input, shape index: {}]   ;;  %s979_s4 = inlined_call_operand.vmem [shape: f32[16,64], index: 4, kind: input, shape index: {}]   ;;  %s980_s5 = inlined_call_operand.hbm [shape: f32[16,64], index: 5, kind: input, shape index: {}]   ;;  %s981_s6 = inlined_call_operand.hbm [shape: bf16[64,256], index: 6, kind: input, shape index: {}]   ;;  %s982_s7 = inlined_call_operand.vmem [shape: f32[1,256], index: 7, kind: input, shape index: {}]   ;;  %s983_s8 = inlined_call_operand.hbm [shape: f32[2,32], index: 8, kind: input, shape index: {}]   ;;  %s984_s9 = inlined_call_operand.hbm [shape: f32[2,32], index: 9, kind: input, shape index: {}]   ;;  %s985_s10 = inlined_call_operand.hbm [shape: f32[2,32], index: 10, kind: input, shape index: {}]   ;;  %s986_s11 = inlined_call_operand.vmem [shape: f32[5], index: 11, kind: output, shape index: {}]  }
   0x1   :  { %17 = vsyncpa [#allocation6], 0 }
   0x2   :  { %18 = vsyncpa [#allocation9], 0 }
   0x3   :  { %19 = vsyncpa [#allocation12], 0 }
   0x4   :  { %20 = vsyncpa [#allocation15], 0 }
   0x5   :  { %21 = vsyncpa [#allocation4], 0  ;;  %s829_s17 = smov [#allocation5]   ;;  %s830_s19 = smov [#allocation8]  }
   0x6   :  { %s41_s18 = sshll.u32 %s829_s17, 4  ;;  %s67_s20 = sshll.u32 %s830_s19, 4  ;;  %s42_s18 = int_to_ptr.vmem [resolvable:$true] %s41_s18  ;;  %s68_s20 = int_to_ptr.vmem [resolvable:$true] %s67_s20 }
   0x7   :  { %s653_s21 = scalar_lea.vmem %s42_s18, 256  ;;  %p658_p1 = scmp.lt.s32.totalorder %s42_s18, %s42_s18 }
   0x8   :  { %p654_p0 = scmp.ne.s32.totalorder %s42_s18, %s653_s21  ;;  %p659_p2 = scmp.lt.s32.totalorder %s653_s21, %s653_s21 }
   0xa   :  { %p660_p3 = por %p659_p2, %p658_p1 }
   0xc   :  { %p661_p4 = pnand %p660_p3, %p654_p0 }
   0xe   :  { %664 = shalt.err (!%p661_p4)
}
   0xf   :  { %s831_s22 = smov 128   ;;  %s832_s23 = smov 8  }
  0x10   :  { %47 = dma.hbm_to_vmem [thread:$0]  %s977_s2, 256, %s42_s18, [#allocation6], %s831_s22, %s831_s22, %s832_s23  }
  0x11   :  { %s673_s26 = scalar_lea.vmem %s68_s20, 256  ;;  %p678_p6 = scmp.lt.s32.totalorder %s68_s20, %s68_s20 }
  0x12   :  { %p674_p5 = scmp.ne.s32.totalorder %s68_s20, %s673_s26  ;;  %p679_p7 = scmp.lt.s32.totalorder %s673_s26, %s673_s26 }
  0x14   :  { %p680_p8 = por %p679_p7, %p678_p6 }
  0x16   :  { %p681_p9 = pnand %p680_p8, %p674_p5 }
  0x18   :  { %684 = shalt.err (!%p681_p9)
}
  0x19   :  { %73 = dma.hbm_to_vmem [thread:$0]  %s980_s5, 256, %s68_s20, [#allocation9], %s831_s22, %s831_s22, %s832_s23  }
  0x1a   :  { %s833_s29 = smov [#allocation11]   ;;  %s834_s12 = smov [#allocation2]  }
  0x1b   :  { %s94_s30 = sshll.u32 %s833_s29, 4  ;;  %s29_s13 = sshll.u32 %s834_s12, 4  ;;  %s95_s30 = int_to_ptr.vmem [resolvable:$true] %s94_s30  ;;  %s30_s13 = int_to_ptr.vmem [resolvable:$true] %s29_s13 }
  0x1c   :  { %s693_s2 = scalar_lea.vmem %s95_s30, 32  ;;  %p698_p11 = scmp.lt.s32.totalorder %s95_s30, %s95_s30 }
  0x1d   :  { %p694_p10 = scmp.ne.s32.totalorder %s95_s30, %s693_s2  ;;  %p699_p12 = scmp.lt.s32.totalorder %s693_s2, %s693_s2 }
  0x1f   :  { %p700_p13 = por %p699_p12, %p698_p11 }
  0x21   :  { %p701_p0 = pnand %p700_p13, %p694_p10 }
  0x23   :  { %704 = shalt.err (!%p701_p0)
}
  0x24   :  { %97 = dma.hbm_to_vmem [thread:$0]  %s983_s8, 32, %s95_s30, [#allocation12]  }
  0x25   :  { %s713_s16 = scalar_lea.vmem %s30_s13, 256  ;;  %p718_p2 = scmp.lt.s32.totalorder %s30_s13, %s30_s13 }
  0x26   :  { %p714_p1 = scmp.ne.s32.totalorder %s30_s13, %s713_s16  ;;  %p719_p3 = scmp.lt.s32.totalorder %s713_s16, %s713_s16 }
  0x28   :  { %p720_p4 = por %p719_p3, %p718_p2 }
  0x2a   :  { %p721_p5 = pnand %p720_p4, %p714_p1 }
  0x2c   :  { %724 = shalt.err (!%p721_p5)
}
  0x2d   :  { %35 = dma.hbm_to_vmem [thread:$0]  %s976_s1, 256, %s30_s13, [#allocation3], %s831_s22, %s831_s22, %s832_s23  }
  0x2e   :  { %s835_s18 = smov [#allocation7]   ;;  %s836_s20 = smov [#allocation10]  }
  0x2f   :  { %s53_s19 = sshll.u32 %s835_s18, 4  ;;  %s79_s21 = sshll.u32 %s836_s20, 4  ;;  %s54_s19 = int_to_ptr.vmem [resolvable:$true] %s53_s19  ;;  %s80_s21 = int_to_ptr.vmem [resolvable:$true] %s79_s21 }
  0x30   :  { %s733_s8 = scalar_lea.vmem %s54_s19, 256  ;;  %p738_p7 = scmp.lt.s32.totalorder %s54_s19, %s54_s19 }
  0x31   :  { %p734_p6 = scmp.ne.s32.totalorder %s54_s19, %s733_s8  ;;  %p739_p8 = scmp.lt.s32.totalorder %s733_s8, %s733_s8 }
  0x33   :  { %p740_p9 = por %p739_p8, %p738_p7 }
  0x35   :  { %p741_p10 = pnand %p740_p9, %p734_p6 }
  0x37   :  { %744 = shalt.err (!%p741_p10)
}
  0x38   :  { %59 = dma.hbm_to_vmem [thread:$0]  %s978_s3, 256, %s54_s19, [#allocation6], %s831_s22, %s831_s22, %s832_s23  }
  0x39   :  { %s753_s1 = scalar_lea.vmem %s80_s21, 1024  ;;  %p758_p12 = scmp.lt.s32.totalorder %s80_s21, %s80_s21 }
  0x3a   :  { %p754_p11 = scmp.ne.s32.totalorder %s80_s21, %s753_s1  ;;  %p759_p13 = scmp.lt.s32.totalorder %s753_s1, %s753_s1 }
  0x3c   :  { %p760_p0 = por %p759_p13, %p758_p12 }
  0x3e   :  { %p761_p1 = pnand %p760_p0, %p754_p11 }
  0x40   :  { %764 = shalt.err (!%p761_p1)
}
  0x41   :  { %85 = dma.hbm_to_vmem [thread:$0]  %s981_s6, 1024, %s80_s21, [#allocation9], %s831_s22, %s831_s22, %s832_s23  }
  0x42   :  { %s837_s28 = smov [#allocation13]   ;;  %s838_s30 = smov [#allocation14]  }
  0x43   :  { %s104_s29 = sshll.u32 %s837_s28, 4  ;;  %s114_s12 = sshll.u32 %s838_s30, 4  ;;  %s105_s29 = int_to_ptr.vmem [resolvable:$true] %s104_s29  ;;  %s115_s12 = int_to_ptr.vmem [resolvable:$true] %s114_s12 }
  0x44   :  { %s773_s3 = scalar_lea.vmem %s105_s29, 32  ;;  %p778_p3 = scmp.lt.s32.totalorder %s105_s29, %s105_s29 }
  0x45   :  { %p774_p2 = scmp.ne.s32.totalorder %s105_s29, %s773_s3  ;;  %p779_p4 = scmp.lt.s32.totalorder %s773_s3, %s773_s3 }
  0x47   :  { %p780_p5 = por %p779_p4, %p778_p3 }
  0x49   :  { %p781_p6 = pnand %p780_p5, %p774_p2 }
  0x4b   :  { %784 = shalt.err (!%p781_p6)
}
  0x4c   :  { %107 = dma.hbm_to_vmem [thread:$0]  %s984_s9, 32, %s105_s29, [#allocation12]  }
  0x4d   :  { %s793_s14 = scalar_lea.vmem %s115_s12, 32  ;;  %p798_p8 = scmp.lt.s32.totalorder %s115_s12, %s115_s12 }
  0x4e   :  { %p794_p7 = scmp.ne.s32.totalorder %s115_s12, %s793_s14  ;;  %p799_p9 = scmp.lt.s32.totalorder %s793_s14, %s793_s14 }
  0x50   :  { %p800_p10 = por %p799_p9, %p798_p8 }
  0x52   :  { %p801_p11 = pnand %p800_p10, %p794_p7 }
  0x54   :  { %804 = shalt.err (!%p801_p11)
}
  0x55   :  { %117 = dma.hbm_to_vmem [thread:$0]  %s985_s10, 32, %s115_s12, [#allocation15]  }
  0x56   :  { %817 = dma.done.wait [#allocation3], 256  }
  0x57   :  { %818 = vsyncadd [#allocation3], 4294967040 }
  0x58   :  { %819 = dma.done.wait [#allocation6], 512  }
  0x59   :  { %820 = vsyncadd [#allocation6], 4294966784 }
  0x5a   :  { %821 = dma.done.wait [#allocation9], 1280  }
  0x5b   :  { %822 = vsyncadd [#allocation9], 4294966016 }
  0x5c   :  { %823 = dma.done.wait [#allocation12], 64  }
  0x5d   :  { %824 = vsyncadd [#allocation12], 4294967232 }
  0x5e   :  { %825 = dma.done.wait [#allocation15], 32  }
  0x5f   :  { %826 = vsyncadd [#allocation15], 4294967264  ;;  %v839_v0 = vmov 0   ;;  %v633_v1 = vld [vmem:[#allocation10 + $0x34] ss:$8 sps:$4 sm:$0xff]   ;;  %v152_v7 = vld [vmem:[%s975_s0] sm:$0xff]  ;;  %v264_v40 = vlaneseq }
  0x60   :  { %235 = vmatprep.mubr.bf16.mxu0 %v839_v0  ;;  %348 = vmatprep.mubr.bf16.mxu1 %v839_v0  ;;  %v635_v2 = vld [vmem:[#allocation10 + $0x30] ss:$8 sps:$4 sm:$0xff]   ;;  %v636_v3 = vld [vmem:[#allocation10 + $0x24] ss:$8 sps:$4 sm:$0xff]   ;;  %v638_v4 = vld [vmem:[#allocation10 + $0x20] ss:$8 sps:$4 sm:$0xff]  }
  0x61   :  { %211 = vmatprep.subr.bf16.mxu0 %v633_v1  ;;  %324 = vmatprep.subr.bf16.mxu1 %v633_v1  ;;  %v639_v5 = vld [vmem:[#allocation10 + $0x14] ss:$8 sps:$4 sm:$0xff]   ;;  %v641_v6 = vld [vmem:[#allocation10 + $0x10] ss:$8 sps:$4 sm:$0xff]   ;;  %v153_v8 = vld [vmem:[%s975_s0 + $0x8] sm:$0xff]  ;;  %vm199_vm0 = vcmask 523264  }
  0x62   :  { %212 = vmatpush1.bf16.msra.mxu0 %v635_v2  ;;  %325 = vmatpush1.bf16.msra.mxu1 %v635_v2  ;;  %v154_v9 = vld [vmem:[#allocation2] sm:$0xff]  ;;  %v155_v10 = vld [vmem:[#allocation2 + $0x8] sm:$0xff]  ;;  %v306_v11 = vld [vmem:[#allocation5] sm:$0xff]  ;;  %v265_v41 = vshrl.u32 %v264_v40, 7  ;;  %vm526_vm1 = vcmask 254976   ;;  %s571_s6 = sshll.u32 %s986_s11, 4  ;;  %s572_s6 = int_to_ptr.vmem [resolvable:$true] %s571_s6 }
  0x63   :  { %213 = vmatprep.subr.bf16.mxu0 %v636_v3  ;;  %326 = vmatprep.subr.bf16.mxu1 %v636_v3  ;;  %v307_v12 = vld [vmem:[#allocation5 + $0x8] sm:$0xff]  ;;  %v308_v13 = vld [vmem:[#allocation7] sm:$0xff]  ;;  %v309_v14 = vld [vmem:[#allocation7 + $0x8] sm:$0xff]  ;;  %v156_v16 = vsub.f32 %v152_v7, %v154_v9  ;;  %v157_v17 = vsub.f32 %v153_v8, %v155_v10  ;;  %s805_s10 = scalar_lea.vmem %s572_s6, 16  ;;  %p810_p13 = scmp.lt.s32.totalorder %s572_s6, %s572_s6 }
  0x64   :  { %v642_v15 = vld [vmem:[#allocation10 + $0x4] ss:$8 sps:$4 sm:$0xff]   ;;  %v310_v18 = vsub.f32 %v306_v11, %v308_v13  ;;  %v311_v19 = vsub.f32 %v307_v12, %v309_v14  ;;  %v644_v20 = vld [vmem:[#allocation10] ss:$8 sps:$4 sm:$0xff]   ;;  %v410_v25 = vld [vmem:[#allocation8] sm:$0xff]  ;;  %v266_v42 = vsub.s32 0, %v265_v41  ;;  %p806_p12 = scmp.ne.s32.totalorder %s572_s6, %s805_s10  ;;  %p811_p0 = scmp.lt.s32.totalorder %s805_s10, %s805_s10 }
  0x65   :  { %v158_v21 = vpack.c.bf16 %v157_v17, %v156_v16  ;;  %v408_v23 = vld [vmem:[%s979_s4] sm:$0xff]  ;;  %v409_v24 = vld [vmem:[%s979_s4 + $0x8] sm:$0xff]  ;;  %v411_v26 = vld [vmem:[#allocation8 + $0x8] sm:$0xff]  ;;  %v291_v30 = vand.u32 2147483647, %v156_v16  ;;  %v270_v44 = vsub.s32 1, %v265_v41 }
  0x66   :  { %214 = vmatpush1.bf16.msra.mxu0 %v638_v4  ;;  %327 = vmatpush1.bf16.msra.mxu1 %v638_v4  ;;  %v312_v22 = vpack.c.bf16 %v311_v19, %v310_v18  ;;  %v954_v27 = vsub.f32 %v408_v23, %v410_v25  ;;  %v956_v28 = vsub.f32 %v409_v24, %v411_v26  ;;  %v292_v31 = vand.u32 2147483647, %v157_v17  ;;  %v151_v43 = vld [vmem:[%s982_s7] sm:$0x3]  ;;  %v521_v24 = vld [vmem:[#allocation13] sm:$0x3]  ;;  %p812_p1 = por %p811_p0, %p810_p13 }
  0x67   :  { %215 = vmatprep.subr.bf16.mxu0 %v639_v5  ;;  %328 = vmatprep.subr.bf16.mxu1 %v639_v5  ;;  %v293_v32 = vsel %vm199_vm0, %v291_v30, 0.0  ;;  %v393_v35 = vand.u32 2147483647, %v310_v18  ;;  %v394_v36 = vand.u32 2147483647, %v311_v19  ;;  %v267_v45 = vrot.slane %v151_v43, %v266_v42 }
  0x68   :  { %v414_v29 = vpack.c.bf16 %v956_v28, %v954_v27  ;;  %v294_v33 = vsel %vm199_vm0, %v292_v31, 0.0  ;;  %v271_v50 = vrot.slane %v151_v43, %v270_v44  ;;  %v520_v23 = vld [vmem:[#allocation11] sm:$0x3]  ;;  %v495_v26 = vand.u32 2147483647, %v954_v27  ;;  %p813_p2 = pnand %p812_p1, %p806_p12 }
  0x69   :  { %v295_v34 = vadd.f32 %v294_v33, %v293_v32  ;;  %v395_v37 = vsel %vm199_vm0, %v393_v35, 0.0  ;;  %v396_v38 = vsel %vm199_vm0, %v394_v36, 0.0  ;;  %v522_v36 = vsub.f32 %v520_v23, %v521_v24 }
  0x6a   :  { %216 = vmatpush1.bf16.msra.mxu0 %v641_v6  ;;  %329 = vmatpush1.bf16.msra.mxu1 %v641_v6  ;;  %v397_v39 = vadd.f32 %v396_v38, %v395_v37  ;;  %v497_v41 = vsel %vm199_vm0, %v495_v26, 0.0 }
  0x6b   :  { %217 = vmatprep.subr.bf16.mxu0 %v642_v15  ;;  %330 = vmatprep.subr.bf16.mxu1 %v642_v15 }
  0x6c   :  { %296 = vadd.xlane.f32.xlu1 %v295_v34  ;;  %v523_v34 = vld [vmem:[#allocation14] sm:$0x3] }
  0x6d   :  { %v524_v43 = vsub.f32 %v520_v23, %v523_v34 }
  0x6e   :  { %218 = vmatpush1.bf16.msra.mxu0 %v644_v20  ;;  %331 = vmatpush1.bf16.msra.mxu1 %v644_v20 }
  0x6f   :  { %426 = vmatprep.subr.bf16.mxu0 %v633_v1 }
  0x70   :  { %398 = vadd.xlane.f32.xlu1 %v397_v39 }
  0x71   :  { %593 = vmatmul.mubr.msk.bf16.vlgmr.msra.gmra.mxu0 %vm199_vm0, %v158_v21  ;;  %594 = vmatmul.mubr.msk.bf16.vlgmr.msra.gmra.mxu1 %vm199_vm0, %v312_v22 }
  0x72   :  { %427 = vmatpush1.bf16.msra.mxu0 %v635_v2  ;;  %450 = vmatprep.mubr.bf16.mxu0 %v839_v0 }
  0x73   :  { %428 = vmatprep.subr.bf16.mxu0 %v636_v3 }
  0x76   :  { %429 = vmatpush1.bf16.msra.mxu0 %v638_v4 }
  0x77   :  { %430 = vmatprep.subr.bf16.mxu0 %v639_v5 }
  0x7a   :  { %431 = vmatpush1.bf16.msra.mxu0 %v641_v6 }
  0x7b   :  { %432 = vmatprep.subr.bf16.mxu0 %v642_v15 }
  0x7e   :  { %433 = vmatpush1.bf16.msra.mxu0 %v644_v20 }
  0x81   :  { %595 = vmatmul.mubr.msk.bf16.vlgmr.msra.gmra.mxu0 %vm199_vm0, %v414_v29  ;;  %v496_v29 = vand.u32 2147483647, %v956_v28  ;;  %v525_v28 = vmul.f32 %v522_v36, %v522_v36 }
  0x83   :  { %v498_v42 = vsel %vm199_vm0, %v496_v29, 0.0 }
 0x131   :  { %v237_v46 = vpop.f32.mrf.mxu0  ;;  %v350_v47 = vpop.f32.mrf.mxu1 }
 0x132   :  { %v246_v48 = vmul.f32 %v237_v46, %v237_v46  ;;  %v359_v49 = vmul.f32 %v350_v47, %v350_v47 }
 0x133   :  { %v239_v51 = vpop.f32.mrf.mxu0  ;;  %v352_v52 = vpop.f32.mrf.mxu1 }
 0x134   :  { %v274_v53 = vmul.f32 %v267_v45, %v246_v48  ;;  %v247_v54 = vmul.f32 %v239_v51, %v239_v51  ;;  %v360_v55 = vmul.f32 %v352_v52, %v352_v52  ;;  %v376_v56 = vmul.f32 %v359_v49, %v267_v45 }
 0x135   :  { %v241_v57 = vpop.f32.mrf.mxu0  ;;  %v354_v58 = vpop.f32.mrf.mxu1  ;;  %v527_v51 = vsel %vm526_vm1, %v525_v28, 0.0 }
 0x136   :  { %v250_v59 = vadd.f32 %v247_v54, %v246_v48  ;;  %v275_v60 = vmul.f32 %v271_v50, %v247_v54  ;;  %v363_v61 = vadd.f32 %v360_v55, %v359_v49  ;;  %v377_v62 = vmul.f32 %v360_v55, %v271_v50 }
 0x137   :  { %v248_v63 = vmul.f32 %v241_v57, %v241_v57  ;;  %v361_v0 = vmul.f32 %v354_v58, %v354_v58  ;;  %v243_v1 = vpop.f32.mrf.mxu0  ;;  %v356_v2 = vpop.f32.mrf.mxu1  ;;  %v499_v48 = vadd.f32 %v498_v42, %v497_v41  ;;  %v539_v49 = vmul.f32 %v524_v43, %v524_v43 }
 0x138   :  { %v278_v3 = vadd.f32 %v275_v60, %v274_v53  ;;  %v249_v4 = vmul.f32 %v243_v1, %v243_v1  ;;  %v362_v5 = vmul.f32 %v356_v2, %v356_v2  ;;  %v380_v9 = vadd.f32 %v377_v62, %v376_v56 }
 0x139   :  { %v276_v6 = vmul.f32 %v267_v45, %v248_v63  ;;  %v364_v7 = vadd.f32 %v363_v61, %v361_v0  ;;  %v251_v8 = vadd.f32 %v250_v59, %v248_v63  ;;  %v378_v10 = vmul.f32 %v361_v0, %v267_v45 }
 0x13a   :  { %v277_v11 = vmul.f32 %v271_v50, %v249_v4  ;;  %v379_v15 = vmul.f32 %v362_v5, %v271_v50  ;;  %v540_v52 = vsel %vm526_vm1, %v539_v49, 0.0 }
 0x13b   :  { %v365_v12 = vadd.f32 %v364_v7, %v362_v5  ;;  %v252_v13 = vadd.f32 %v251_v8, %v249_v4  ;;  %v279_v14 = vadd.f32 %v278_v3, %v276_v6  ;;  %v381_v17 = vadd.f32 %v380_v9, %v378_v10 }
 0x13d   :  { %366 = vadd.xlane.f32.xlu1 %v365_v12  ;;  %253 = vadd.xlane.f32.xlu0 %v252_v13  ;;  %v280_v16 = vadd.f32 %v279_v14, %v277_v11  ;;  %v382_v21 = vadd.f32 %v381_v17, %v379_v15 }
 0x141   :  { %281 = vadd.xlane.f32.xlu0 %v280_v16  ;;  %v452_v18 = vpop.f32.mrf.mxu0 }
 0x142   :  { %v461_v19 = vmul.f32 %v452_v18, %v452_v18 }
 0x143   :  { %v454_v20 = vpop.f32.mrf.mxu0 }
 0x144   :  { %v462_v22 = vmul.f32 %v454_v20, %v454_v20  ;;  %v478_v30 = vmul.f32 %v461_v19, %v267_v45 }
 0x145   :  { %383 = vadd.xlane.f32.xlu0 %v382_v21  ;;  %v456_v25 = vpop.f32.mrf.mxu0 }
 0x146   :  { %v465_v31 = vadd.f32 %v462_v22, %v461_v19  ;;  %v479_v32 = vmul.f32 %v462_v22, %v271_v50  ;;  %v463_v33 = vmul.f32 %v456_v25, %v456_v25 }
 0x147   :  { %v458_v35 = vpop.f32.mrf.mxu0 }
 0x148   :  { %v482_v37 = vadd.f32 %v479_v32, %v478_v30  ;;  %v466_v38 = vadd.f32 %v465_v31, %v463_v33  ;;  %v480_v39 = vmul.f32 %v463_v33, %v267_v45  ;;  %v464_v40 = vmul.f32 %v458_v35, %v458_v35  ;;  %v297_v45 = vpop.xlane.xlu1 %296 }
 0x149   :  { %v298_v54 = vrot.slane %v297_v45, 4 }
 0x14a   :  { %v481_v44 = vmul.f32 %v464_v40, %v271_v50  ;;  %v467_v27 = vadd.f32 %v466_v38, %v464_v40  ;;  %v483_v46 = vadd.f32 %v482_v37, %v480_v39 }
 0x14b   :  { %v299_v55 = vadd.f32 %v298_v54, %v297_v45 }
 0x14c   :  { %468 = vadd.xlane.f32.xlu0 %v467_v27  ;;  %v484_v47 = vadd.f32 %v483_v46, %v481_v44  ;;  %v399_v53 = vpop.xlane.xlu1 %398 }
 0x14d   :  { %v400_v56 = vrot.slane %v399_v53, 4  ;;  %v300_v62 = vrot.slane %v299_v55, 2 }
 0x14e   :  { %485 = vadd.xlane.f32.xlu1 %v484_v47 }
 0x14f   :  { %v401_v63 = vadd.f32 %v400_v56, %v399_v53  ;;  %v301_v8 = vadd.f32 %v300_v62, %v299_v55 }
 0x150   :  { %500 = vadd.xlane.f32.xlu0 %v499_v48 }
 0x151   :  { %v402_v6 = vrot.slane %v401_v63, 2  ;;  %v302_v16 = vrot.slane %v301_v8, 1 }
 0x152   :  { %528 = vadd.xlane.f32.xlu1 %v527_v51 }
 0x153   :  { %v403_v17 = vadd.f32 %v402_v6, %v401_v63  ;;  %v303_v25 = vadd.f32 %v302_v16, %v301_v8 }
 0x154   :  { %541 = vadd.xlane.f32.xlu0 %v540_v52 }
 0x155   :  { %v404_v26 = vrot.slane %v403_v17, 1 }
 0x157   :  { %v405_v39 = vadd.f32 %v404_v26, %v403_v17 }
 0x1c6   :  { %v367_v50 = vpop.xlane.xlu1 %366  ;;  %v254_v57 = vpop.xlane.xlu0 %253 }
 0x1c7   :  { %v368_v58 = vrot.slane %v367_v50, 4  ;;  %v255_v59 = vrot.slane %v254_v57, 4 }
 0x1c9   :  { %v369_v60 = vadd.f32 %v368_v58, %v367_v50  ;;  %v256_v61 = vadd.f32 %v255_v59, %v254_v57 }
 0x1ca   :  { %v282_v0 = vpop.xlane.xlu0 %281 }
 0x1cb   :  { %v370_v1 = vrot.slane %v369_v60, 2  ;;  %v257_v2 = vrot.slane %v256_v61, 2  ;;  %v283_v3 = vrot.slane %v282_v0, 4 }
 0x1cd   :  { %v284_v4 = vadd.f32 %v283_v3, %v282_v0  ;;  %v258_v5 = vadd.f32 %v257_v2, %v256_v61  ;;  %v371_v12 = vadd.f32 %v370_v1, %v369_v60 }
 0x1ce   :  { %v384_v7 = vpop.xlane.xlu0 %383 }
 0x1cf   :  { %v285_v9 = vrot.slane %v284_v4, 2  ;;  %v385_v10 = vrot.slane %v384_v7, 4  ;;  %v259_v11 = vrot.slane %v258_v5, 1  ;;  %v372_v20 = vrot.slane %v371_v12, 1 }
 0x1d1   :  { %v386_v13 = vadd.f32 %v385_v10, %v384_v7  ;;  %v260_v14 = vadd.f32 %v259_v11, %v258_v5  ;;  %v286_v15 = vadd.f32 %v285_v9, %v284_v4  ;;  %v373_v29 = vadd.f32 %v372_v20, %v371_v12 }
 0x1d3   :  { %v387_v18 = vrot.slane %v386_v13, 2  ;;  %598 = vpush %v260_v14  ;;  %v287_v19 = vrot.slane %v286_v15, 1 }
 0x1d5   :  { %v469_v21 = vpop.xlane.xlu0 %468  ;;  %v288_v22 = vadd.f32 %v287_v19, %v286_v15  ;;  %v388_v23 = vadd.f32 %v387_v18, %v386_v13 }
 0x1d6   :  { %v470_v24 = vrot.slane %v469_v21, 4 }
 0x1d7   :  { %600 = vpush %v288_v22  ;;  %v486_v30 = vpop.xlane.xlu1 %485  ;;  %v389_v31 = vrot.slane %v388_v23, 1 }
 0x1d8   :  { %v471_v32 = vadd.f32 %v470_v24, %v469_v21  ;;  %602 = vpush %v303_v25  ;;  %v487_v33 = vrot.slane %v486_v30, 4 }
 0x1d9   :  { %604 = vpush %v373_v29  ;;  %v501_v34 = vpop.xlane.xlu0 %500  ;;  %v390_v35 = vadd.f32 %v389_v31, %v388_v23 }
 0x1da   :  { %v472_v36 = vrot.slane %v471_v32, 2  ;;  %v488_v37 = vadd.f32 %v487_v33, %v486_v30  ;;  %v502_v38 = vrot.slane %v501_v34, 4 }
 0x1db   :  { %606 = vpush %v390_v35  ;;  %v529_v40 = vpop.xlane.xlu1 %528 }
 0x1dc   :  { %v489_v41 = vrot.slane %v488_v37, 2  ;;  %v503_v42 = vadd.f32 %v502_v38, %v501_v34  ;;  %608 = vpush %v405_v39  ;;  %v530_v43 = vrot.slane %v529_v40, 4  ;;  %v473_v44 = vadd.f32 %v472_v36, %v471_v32 }
 0x1dd   :  { %v542_v27 = vpop.xlane.xlu0 %541 }
 0x1de   :  { %v504_v46 = vrot.slane %v503_v42, 2  ;;  %v531_v28 = vadd.f32 %v530_v43, %v529_v40  ;;  %v543_v47 = vrot.slane %v542_v27, 4  ;;  %v474_v48 = vrot.slane %v473_v44, 1 }
 0x1df   :  { %v490_v49 = vadd.f32 %v489_v41, %v488_v37 }
 0x1e0   :  { %v532_v51 = vrot.slane %v531_v28, 2  ;;  %v544_v52 = vadd.f32 %v543_v47, %v542_v27  ;;  %v475_v45 = vadd.f32 %v474_v48, %v473_v44  ;;  %v505_v53 = vadd.f32 %v504_v46, %v503_v42 }
 0x1e1   :  { %v491_v54 = vrot.slane %v490_v49, 1 }
 0x1e2   :  { %v533_v55 = vadd.f32 %v532_v51, %v531_v28  ;;  %v545_v56 = vrot.slane %v544_v52, 2  ;;  %610 = vpush %v475_v45  ;;  %v506_v50 = vrot.slane %v505_v53, 1 }
 0x1e3   :  { %v492_v57 = vadd.f32 %v491_v54, %v490_v49 }
 0x1e4   :  { %v546_v58 = vadd.f32 %v545_v56, %v544_v52  ;;  %v507_v59 = vadd.f32 %v506_v50, %v505_v53  ;;  %v534_v60 = vrot.slane %v533_v55, 1 }
 0x1e5   :  { %612 = vpush %v492_v57 }
 0x1e6   :  { %614 = vpush %v507_v59  ;;  %v535_v61 = vadd.f32 %v534_v60, %v533_v55  ;;  %v547_v62 = vrot.slane %v546_v58, 1 }
 0x1e8   :  { %616 = vpush %v535_v61  ;;  %v548_v63 = vadd.f32 %v547_v62, %v546_v58 }
 0x1ea   :  { %618 = vpush %v548_v63 }
 0x204   :  { %s599_s7 = spop %598 }
 0x208   :  { %s601_s19 = spop %600 }
 0x209   :  { %s603_s20 = spop %602 }
 0x20a   :  { %s605_s21 = spop %604 }
 0x20b   :  { %s375_s25 = sadd.f32 %s605_s21, %s599_s7 }
 0x20c   :  { %s607_s8 = spop %606 }
 0x20d   :  { %s609_s24 = spop %608  ;;  %s392_s26 = sadd.f32 %s607_s8, %s601_s19 }
 0x20e   :  { %s407_s27 = sadd.f32 %s609_s24, %s603_s20 }
 0x213   :  { %s611_s1 = spop %610 }
 0x214   :  { %s477_s28 = sadd.f32 %s611_s1, %s375_s25 }
 0x216   :  { %s613_s29 = spop %612 }
 0x217   :  { %s494_s30 = sadd.f32 %s613_s29, %s392_s26  ;;  %s615_s12 = spop %614 }
 0x218   :  { %s509_s3 = sadd.f32 %s615_s12, %s407_s27 }
 0x219   :  { %s557_s13 = ssub.f32 %s477_s28, %s494_s30  ;;  %s617_s22 = spop %616 }
 0x21a   :  { %555 = sst [smem:[#allocation16]] %s494_s30 }
 0x21b   :  { %560 = sst [smem:[#allocation16 + $0x1]] %s557_s13  ;;  %s619_s9 = spop %618 }
 0x21c   :  { %564 = sst [smem:[#allocation16 + $0x2]] %s509_s3 }
 0x21d   :  { %538 = sst [smem:[#allocation16 + $0x3]] %s617_s22 }
 0x21e   :  { %551 = sst [smem:[#allocation16 + $0x4]] %s619_s9 }
 0x21f   :  { %816 = shalt.err (!%p813_p2)
}
 0x220   :  { %s840_s23 = smov [#allocation16]  }
 0x221   :  { %574 = dma.smem_to_vmem %s840_s23, 16, %s572_s6, [#allocation4]  }
 0x222   :  { %827 = dma.done.wait [#allocation4], 16  }
 0x223   :  { %828 = vsyncadd [#allocation4], 4294967280 }
 0x224   :  { %578 = sfence }
 0x225   :  { %579 = vsyncpa [#allocation3], 1 }
 0x226   :  { %580 = vsyncpa [#allocation6], 1 }
 0x227   :  { %581 = vsyncpa [#allocation9], 1 }
 0x228   :  { %582 = vsyncpa [#allocation12], 1 }
 0x229   :  { %583 = vsyncpa [#allocation15], 1 }
 0x22a   :  { %584 = vsyncpa [#allocation4], 1 }

</bundles_post_ra>
